<compile_context>
chip_gen: v7x
topology: tpu7x:2x2x1
jax: 0.10.0
libtpu: 0.0.40
codegen_flags: <defaults>
</compile_context>

<pallas_src>
import functools

import jax
import jax.numpy as jnp
from jax import lax
from jax.experimental import pallas as pl
from jax.experimental.pallas import tpu as pltpu


def _round_up(x, m):
    return (x + m - 1) // m * m


def _sublane(dtype):
    return {1: 32, 2: 16, 4: 8}.get(jnp.dtype(dtype).itemsize, 8)


# ---------------------------------------------------------------------------
# Packed lane-dense path: x viewed as (R, P*HW), scale as (ncomp, R, P) bf16.
# ---------------------------------------------------------------------------
def _packed_scale_mul_kernel(hw, ncomp, s_ref, x_ref, o_ref):
    # s_ref: (ncomp, R, P) bf16 scale components (their sum == the scale)
    # x_ref / o_ref: (R, P*HW) in the caller's dtype
    p = s_ref.shape[2]
    row = x_ref.shape[1]

    # one-hot[k, j] = 1 iff lane j belongs to packed channel k, built with a
    # range test (no integer divide) directly in bf16 (0/1 are exact).
    lane = lax.broadcasted_iota(jnp.int32, (p, row), 1)
    lo = lax.broadcasted_iota(jnp.int32, (p, row), 0) * hw
    onehot = ((lane >= lo) & (lane < lo + hw)).astype(jnp.bfloat16)

    # Expand the scale to the packed row with single-pass bf16 MXU matmuls.
    # Exactly one 1.0 hits each column, and bf16 * {0,1} accumulated in f32 is
    # exact, so the sum of the components reproduces the original scale.
    expanded = jnp.dot(s_ref[0], onehot, preferred_element_type=jnp.float32)
    for i in range(1, ncomp):
        expanded = expanded + jnp.dot(s_ref[i], onehot,
                                      preferred_element_type=jnp.float32)

    x = x_ref[...]
    # Multiply in the caller's dtype (bf16 VPU on v6e/v7x); one down-cast of
    # the expanded scale instead of up-casting the whole feature map.
    o_ref[...] = (expanded.astype(x.dtype) * x).astype(o_ref.dtype)


def _packed_scale_mul(s_comps, x2d, hw, pack, out_dtype, vmem_limit, alias_x):
    nc = x2d.shape[0]
    r = nc // pack
    row = pack * hw
    ncomp = s_comps.shape[0]

    x_pk = x2d.reshape(r, row)                 # zero-copy view of NCHW buffer
    s_pk = s_comps.reshape(ncomp, r, pack)

    kernel = functools.partial(_packed_scale_mul_kernel, hw, ncomp)
    out = pl.pallas_call(
        kernel,
        out_shape=jax.ShapeDtypeStruct((r, row), out_dtype),
        grid_spec=pltpu.PrefetchScalarGridSpec(
            num_scalar_prefetch=0,
            grid=(1,),
            in_specs=[
                pl.BlockSpec((ncomp, r, pack), lambda i: (0, 0, 0)),
                pl.BlockSpec((r, row), lambda i: (0, 0)),
            ],
            out_specs=pl.BlockSpec((r, row), lambda i: (0, 0)),
        ),
        compiler_params=pltpu.CompilerParams(
            dimension_semantics=("arbitrary",),
            vmem_limit_bytes=vmem_limit),
        input_output_aliases=({1: 0} if alias_x else {}),
    )(s_pk, x_pk)
    return out.reshape(nc, hw)


def _choose_pack(nc, hw, dtype, ncomp, vmem_budget):
    """Pick a pack factor P (divisor of nc) minimising in-kernel vector work."""
    itemsize = jnp.dtype(dtype).itemsize
    sub = _sublane(dtype)
    best, best_cost = None, None
    for p in range(8, 65):
        if nc % p:
            continue
        r = nc // p
        row = p * hw
        row_pad = _round_up(row, 128)
        r_pad = _round_up(r, sub)
        # Vector-work model (elements touched): x load/mul/store, f32 expanded
        # scale (+ MXU result pops), and the int32 one-hot build (grows ~P^2*HW
        # — the v7x-critical term).  HBM bytes do not depend on P.
        cost = (3 * r_pad * row_pad
                + 2 * _round_up(r, 8) * row_pad
                + 4 * _round_up(p, 8) * row_pad)
        # VMEM estimate: (double-buffered) x/out blocks + f32/int temporaries.
        vmem = (4 * r_pad * row_pad * itemsize
                + 2 * _round_up(r, 8) * row_pad * 4
                + 3 * _round_up(p, 8) * row_pad * 4
                + 2 * ncomp * _round_up(r, 16) * _round_up(p, 128) * 2)
        if vmem > vmem_budget:
            continue
        if best_cost is None or cost < best_cost:
            best, best_cost = p, cost
    return best


def _split_scale_bf16(s, dtype):
    """Exact bf16 decomposition of the scale (sum of components == scale)."""
    if dtype == jnp.bfloat16:
        return s.astype(jnp.bfloat16)[None]
    # float32: three bf16 chunks cover the 24-bit mantissa exactly (ignoring
    # extreme subnormal / near-overflow values, irrelevant for SE scales).
    c0 = s.astype(jnp.bfloat16)
    r1 = s - c0.astype(jnp.float32)
    c1 = r1.astype(jnp.bfloat16)
    r2 = r1 - c1.astype(jnp.float32)
    c2 = r2.astype(jnp.bfloat16)
    return jnp.stack([c0, c1, c2])


# ---------------------------------------------------------------------------
# Fallback path: (NC, HW) rows, tiled over channels with a budgeted tile.
# ---------------------------------------------------------------------------
def _rowwise_scale_mul_kernel(s_ref, x_ref, o_ref):
    o_ref[...] = (s_ref[...] * x_ref[...]).astype(o_ref.dtype)


def _rowwise_scale_mul(s2d, x2d, hw, out_dtype, vmem_budget, alias_x):
    nc = x2d.shape[0]
    row_bytes = _round_up(hw, 128) * (x2d.dtype.itemsize
                                      + jnp.dtype(out_dtype).itemsize + 8)
    max_rows = max(8, vmem_budget // (2 * row_bytes))
    if nc <= max_rows:
        tc = nc
    else:
        tc = None
        t = 8
        while t <= max_rows:
            if nc % t == 0:
                tc = t
            t += 8
        if tc is None:
            # TODO(synk): pad NC to a multiple of 8 and mask the tail instead
            # of a single whole-array block for awkward channel counts.
            tc = nc
    out = pl.pallas_call(
        _rowwise_scale_mul_kernel,
        out_shape=jax.ShapeDtypeStruct((nc, hw), out_dtype),
        grid_spec=pltpu.PrefetchScalarGridSpec(
            num_scalar_prefetch=0,
            grid=(nc // tc,),
            in_specs=[
                pl.BlockSpec((tc, 1), lambda i: (i, 0)),
                pl.BlockSpec((tc, hw), lambda i: (i, 0)),
            ],
            out_specs=pl.BlockSpec((tc, hw), lambda i: (i, 0)),
        ),
        compiler_params=pltpu.CompilerParams(
            dimension_semantics=("parallel",),
            vmem_limit_bytes=vmem_budget),
        input_output_aliases=({1: 0} if alias_x else {}),
    )(s2d, x2d)
    return out


# ---------------------------------------------------------------------------
# Public wrapper: x489 * x484 with NumPy/PyTorch broadcasting semantics.
# ---------------------------------------------------------------------------
def se_scale_mul(x489, x484, *, vmem_budget_bytes=24 * 1024 * 1024,
                 donate_features=False):
    """x489: (1, C, 1, 1), x484: (N, C, H, W) -> (N, C, H, W)."""
    n, c, h, w = x484.shape
    sn = x489.shape[0]
    assert x489.shape == (sn, c, 1, 1) and sn in (1, n)
    hw = h * w
    nc = n * c
    out_dtype = jnp.result_type(x489.dtype, x484.dtype)

    x2d = x484.reshape(nc, hw)                 # (NC, HW) zero-copy view
    if sn == n:
        s_vec = x489.reshape(nc)
    else:
        s_vec = x489.reshape(c)
        if n > 1:
            s_vec = jnp.tile(s_vec, (n,))

    same_dtype = x489.dtype == x484.dtype
    packable = same_dtype and out_dtype in (jnp.float32, jnp.bfloat16)

    pack = None
    if packable and hw % 128 != 0:
        ncomp = 1 if out_dtype == jnp.bfloat16 else 3
        pack = _choose_pack(nc, hw, out_dtype, ncomp, vmem_budget_bytes)

    alias_x = donate_features and (x484.dtype == out_dtype)
    if pack is not None:
        s_comps = _split_scale_bf16(s_vec.astype(out_dtype), out_dtype)
        out2d = _packed_scale_mul(s_comps, x2d, hw, pack, out_dtype,
                                  vmem_budget_bytes, alias_x)
    else:
        out2d = _rowwise_scale_mul(s_vec.reshape(nc, 1), x2d, hw, out_dtype,
                                   vmem_budget_bytes, alias_x)

    return out2d.reshape(n, c, h, w)


if __name__ == "__main__":
    key = jax.random.PRNGKey(0)
    k1, k2, k3, k4 = jax.random.split(key, 4)

    # Shapes from the reference module: x484 [1,1824,7,7], x489 [1,1824,1,1].
    C, H, W = 1824, 7, 7
    x484 = jax.random.normal(k1, (1, C, H, W), dtype=jnp.float32)
    x489 = jax.random.normal(k2, (1, C, 1, 1), dtype=jnp.float32)

    out = se_scale_mul(x489, x484)
    jax.block_until_ready(out)
    ref = x489 * x484
    assert out.shape == ref.shape == (1, C, H, W)
    assert jnp.allclose(out, ref, atol=1e-6, rtol=1e-6)

    # bf16 production path: single-pass bf16 MXU expansion, caller-dtype mul.
    xb16 = x484.astype(jnp.bfloat16)
    sb16 = x489.astype(jnp.bfloat16)
    outb16 = se_scale_mul(sb16, xb16)
    jax.block_until_ready(outb16)
    refb16 = (sb16 * xb16).astype(jnp.float32)
    assert jnp.allclose(outb16.astype(jnp.float32), refb16, atol=1e-2, rtol=1e-2)

    # Row-wise fallback path (channel count with no usable pack factor).
    C2, H2, W2 = 6, 5, 5
    xs = jax.random.normal(k3, (1, C2, H2, W2), dtype=jnp.float32)
    ss = jax.random.normal(k4, (1, C2, 1, 1), dtype=jnp.float32)
    outs = se_scale_mul(ss, xs)
    jax.block_until_ready(outs)
    assert jnp.allclose(outs, ss * xs, atol=1e-6, rtol=1e-6)

    print("KERNEL_OK")
</pallas_src>

<mosaic_0001>
module attributes {stable_mosaic.version = 11 : i64} {
  func.func @_packed_scale_mul_kernel(%arg0: i32, %arg1: memref<3x152x12xbf16, #tpu.memory_space<vmem>>, %arg2: memref<152x588xf32, #tpu.memory_space<vmem>>, %arg3: memref<152x588xf32, #tpu.memory_space<vmem>>) attributes {dimension_semantics = [#tpu.dimension_semantics<arbitrary>], iteration_bounds = array<i64: 1>, scalar_prefetch = 0 : i64, scratch_operands = 0 : i64, tpu.core_type = #tpu.core_type<tc>, window_params = [{pipeline_mode = #tpu.pipeline_mode<synchronous>, transform_indices = @transform_0, window_bounds = array<i64: 3, 152, 12>}, {pipeline_mode = #tpu.pipeline_mode<synchronous>, transform_indices = @transform_1, window_bounds = array<i64: 152, 588>}, {pipeline_mode = #tpu.pipeline_mode<synchronous>, transform_indices = @transform_2, window_bounds = array<i64: 152, 588>}]} {
    %0 = tpu.iota {dimensions = array<i32: 1>} : vector<12x588xi32>
    %1 = tpu.iota {dimensions = array<i32: 0>} : vector<12x588xi32>
    %c49_i32 = arith.constant 49 : i32
    %2 = vector.broadcast %c49_i32 : i32 to vector<12x588xi32>
    %3 = arith.muli %1, %2 : vector<12x588xi32>
    %4 = arith.cmpi sge, %0, %3 : vector<12x588xi32>
    %c49_i32_0 = arith.constant 49 : i32
    %5 = vector.broadcast %c49_i32_0 : i32 to vector<12x588xi32>
    %6 = arith.addi %3, %5 : vector<12x588xi32>
    %7 = arith.cmpi slt, %0, %6 : vector<12x588xi32>
    %8 = arith.andi %4, %7 : vector<12x588xi1>
    %9 = arith.extui %8 : vector<12x588xi1> to vector<12x588xi32>
    %10 = arith.sitofp %9 : vector<12x588xi32> to vector<12x588xf32>
    %11 = arith.truncf %10 : vector<12x588xf32> to vector<12x588xbf16>
    %c0 = arith.constant 0 : index
    %c0_1 = arith.constant 0 : index
    %c0_2 = arith.constant 0 : index
    %12 = vector.load %arg1[%c0, %c0_1, %c0_2] : memref<3x152x12xbf16, #tpu.memory_space<vmem>>, vector<1x152x12xbf16>
    %13 = vector.shape_cast %12 : vector<1x152x12xbf16> to vector<152x12xbf16>
    %cst = arith.constant dense<0.000000e+00> : vector<152x588xf32>
    %14 = tpu.matmul %13, %11, %cst {dimension_numbers = #tpu.dot_dimension_numbers<[1], [0], [0], [1], [0, 0, 1, 1], [], []>} : vector<152x12xbf16>, vector<12x588xbf16>, vector<152x588xf32> -> vector<152x588xf32>
    %c1 = arith.constant 1 : index
    %c0_3 = arith.constant 0 : index
    %c0_4 = arith.constant 0 : index
    %15 = vector.load %arg1[%c1, %c0_3, %c0_4] : memref<3x152x12xbf16, #tpu.memory_space<vmem>>, vector<1x152x12xbf16>
    %16 = vector.shape_cast %15 : vector<1x152x12xbf16> to vector<152x12xbf16>
    %cst_5 = arith.constant dense<0.000000e+00> : vector<152x588xf32>
    %17 = tpu.matmul %16, %11, %cst_5 {dimension_numbers = #tpu.dot_dimension_numbers<[1], [0], [0], [1], [0, 0, 1, 1], [], []>} : vector<152x12xbf16>, vector<12x588xbf16>, vector<152x588xf32> -> vector<152x588xf32>
    %18 = arith.addf %14, %17 : vector<152x588xf32>
    %c2 = arith.constant 2 : index
    %c0_6 = arith.constant 0 : index
    %c0_7 = arith.constant 0 : index
    %19 = vector.load %arg1[%c2, %c0_6, %c0_7] : memref<3x152x12xbf16, #tpu.memory_space<vmem>>, vector<1x152x12xbf16>
    %20 = vector.shape_cast %19 : vector<1x152x12xbf16> to vector<152x12xbf16>
    %cst_8 = arith.constant dense<0.000000e+00> : vector<152x588xf32>
    %21 = tpu.matmul %20, %11, %cst_8 {dimension_numbers = #tpu.dot_dimension_numbers<[1], [0], [0], [1], [0, 0, 1, 1], [], []>} : vector<152x12xbf16>, vector<12x588xbf16>, vector<152x588xf32> -> vector<152x588xf32>
    %22 = arith.addf %18, %21 : vector<152x588xf32>
    %c0_9 = arith.constant 0 : index
    %c0_10 = arith.constant 0 : index
    %23 = vector.load %arg2[%c0_9, %c0_10] : memref<152x588xf32, #tpu.memory_space<vmem>>, vector<152x588xf32>
    %24 = arith.mulf %22, %23 : vector<152x588xf32>
    %c0_11 = arith.constant 0 : index
    %c0_12 = arith.constant 0 : index
    %25 = vector.load %arg3[%c0_11, %c0_12] : memref<152x588xf32, #tpu.memory_space<vmem>>, vector<152x588xf32>
    tpu.vector_store %arg3[%c0_11, %c0_12], %24 {strides = array<i32>} : memref<152x588xf32, #tpu.memory_space<vmem>>, vector<152x588xf32>,
    return
  }
  func.func @transform_0(%arg0: i32) -> (i32, i32, i32) {
    %c0_i32 = arith.constant 0 : i32
    %c0_i32_0 = arith.constant 0 : i32
    %c0_i32_1 = arith.constant 0 : i32
    %c0_i32_2 = arith.constant 0 : i32
    return %c0_i32, %c0_i32_0, %c0_i32_1 : i32, i32, i32
  }
  func.func @transform_1(%arg0: i32) -> (i32, i32) {
    %c0_i32 = arith.constant 0 : i32
    %c0_i32_0 = arith.constant 0 : i32
    %c0_i32_1 = arith.constant 0 : i32
    return %c0_i32, %c0_i32_0 : i32, i32
  }
  func.func @transform_2(%arg0: i32) -> (i32, i32) {
    %c0_i32 = arith.constant 0 : i32
    %c0_i32_0 = arith.constant 0 : i32
    %c0_i32_1 = arith.constant 0 : i32
    return %c0_i32, %c0_i32_0 : i32, i32
  }
}

</mosaic_0001>

<bundles_post_ra>
// kernel: tpu_custom_call.1
= control target key start
LH: loop header
LB: loop body
LE: loop exit
PB: predicated region body
PF: predicated region fallthrough
CT: control target
= control target key end

     0   :  { %7 = vsyncpa [#allocation3], 0  ;;  %s2959_s0 = inlined_call_operand.vmem [shape: bf16[3,152,12], index: 0, kind: input, shape index: {}]   ;;  %s2960_s1 = inlined_call_operand.hbm [shape: f32[152,588], index: 1, kind: input, shape index: {}]   ;;  %s2961_s2 = inlined_call_operand.hbm [shape: f32[152,588], index: 2, kind: output, shape index: {}]  }
   0x1   :  { %8 = vsyncpa [#allocation4], 0  ;;  %s2485_s9 = smov [#allocation2]   ;;  %s2437_s13 = scalar_lea.hbm %s2960_s1, 12160 }
   0x2   :  { %s16_s10 = sshll.u32 %s2485_s9, 4  ;;  %p2438_p0 = scmp.ne.s32.totalorder %s2960_s1, %s2437_s13  ;;  %s17_s10 = int_to_ptr.vmem [resolvable:$true] %s16_s10 }
   0x3   :  { %p2441_p1 = scmp.lt.u32.totalorder %s2437_s13, %s2960_s1 }
   0x5   :  { %p2443_p2 = pnand %p2441_p1, %p2438_p0 }
   0x7   :  { %2446 = shalt.err (!%p2443_p2)
}
   0x8   :  { %s2447_s18 = scalar_lea.vmem %s17_s10, 12160  ;;  %p2452_p4 = scmp.lt.s32.totalorder %s17_s10, %s17_s10 }
   0x9   :  { %p2448_p3 = scmp.ne.s32.totalorder %s17_s10, %s2447_s18  ;;  %p2453_p5 = scmp.lt.s32.totalorder %s2447_s18, %s2447_s18 }
   0xb   :  { %p2454_p6 = por %p2453_p5, %p2452_p4 }
   0xd   :  { %p2455_p7 = pnand %p2454_p6, %p2448_p3 }
   0xf   :  { %2458 = shalt.err (!%p2455_p7)
}
  0x10   :  { %s2486_s19 = smov 640   ;;  %s2487_s20 = smov 40  }
  0x11   :  { %22 = dma.hbm_to_vmem [thread:$0]  %s2960_s1, 12160, %s17_s10, [#allocation3], %s2486_s19, %s2486_s19, %s2487_s20  }
  0x12   :  { %2481 = dma.done.wait [#allocation3], 12160  }
  0x13   :  { %2482 = vsyncadd [#allocation3], 4294955136  ;;  %v27_v0 = vlaneseq  ;;  %v2488_v1 = vmov 0   ;;  %v2489_v13 = vmov 0.0   ;;  %vm213_vm15 = vcmask 1045504   ;;  %v2531_v20 = vld [vmem:[%s2959_s0 + $0x4c] sm:$0xff]  }
  0x14   :  { %261 = vmatprep.mubr.bf16.mxu0 %v2488_v1  ;;  %291 = vmatprep.mubr.bf16.mxu1 %v2488_v1  ;;  %v2545_v24 = vld [vmem:[%s2959_s0 + $0x64] sm:$0xff]   ;;  %v2409_v34 = vld [vmem:[%s2959_s0 + $0x54] sm:$0xff]   ;;  %v2410_v35 = vld [vmem:[%s2959_s0 + $0x6c] sm:$0xff]  }
  0x15   :  { %v28_v2 = vand.u32 127, %v27_v0  ;;  %v34_v3 = vshrl.u32 %v27_v0, 7  ;;  %v2411_v36 = vld [vmem:[%s2959_s0 + $0x5c] sm:$0xff]   ;;  %v2412_v37 = vld [vmem:[%s2959_s0 + $0x74] sm:$0xff]   ;;  %v2414_v39 = vld [vmem:[%s2959_s0 + $0x84] sm:$0xff]  }
  0x16   :  { %v2413_v38 = vld [vmem:[%s2959_s0 + $0x7c] sm:$0xff]   ;;  %v2415_v40 = vld [vmem:[%s2959_s0 + $0x8c] sm:$0xff]   ;;  %v2416_v41 = vld [vmem:[%s2959_s0 + $0x94] ss:$0 sps:$4 sm:$0xff]  }
  0x17   :  { %v29_v4 = vadd.s32 128, %v28_v2  ;;  %v35_v5 = vadd.s32 8, %v34_v3  ;;  %v36_v6 = vmul.u32 49, %v34_v3  ;;  %v32_v7 = vadd.s32 512, %v28_v2  ;;  %v2417_v42 = vld [vmem:[%s2959_s0] sm:$0xff]   ;;  %v2418_v43 = vld [vmem:[%s2959_s0 + $0x8] sm:$0xff]  }
  0x18   :  { %v31_v11 = vadd.s32 384, %v28_v2  ;;  %v30_v12 = vadd.s32 256, %v28_v2  ;;  %v2419_v44 = vld [vmem:[%s2959_s0 + $0x10] sm:$0xff]   ;;  %v2420_v45 = vld [vmem:[%s2959_s0 + $0x18] sm:$0xff]   ;;  %v2421_v46 = vld [vmem:[%s2959_s0 + $0x20] sm:$0xff]  }
  0x19   :  { %v37_v8 = vmul.u32 49, %v35_v5  ;;  %vm39_vm0 = vcmp.ge.s32.totalorder %v29_v4, %v36_v6  ;;  %v48_v9 = vadd.s32 49, %v36_v6  ;;  %vm38_vm1 = vcmp.ge.s32.totalorder %v28_v2, %v36_v6  ;;  %v2422_v47 = vld [vmem:[%s2959_s0 + $0x28] sm:$0xff]   ;;  %v2423_v48 = vld [vmem:[%s2959_s0 + $0x30] sm:$0xff]   ;;  %v2424_v49 = vld [vmem:[%s2959_s0 + $0x38] sm:$0xff]  }
  0x1a   :  { %v2425_v50 = vld [vmem:[%s2959_s0 + $0x40] sm:$0xff]   ;;  %v2426_v51 = vld [vmem:[%s2959_s0 + $0x48] ss:$0 sps:$4 sm:$0xff]   ;;  %v2738_v52 = vld [vmem:[%s2959_s0 + $0x98] sm:$0xff]  }
  0x1b   :  { %vm44_vm2 = vcmp.ge.s32.totalorder %v29_v4, %v37_v8  ;;  %v49_v10 = vadd.s32 49, %v37_v8  ;;  %vm51_vm3 = vcmp.lt.s32.totalorder %v29_v4, %v48_v9  ;;  %vm43_vm5 = vcmp.ge.s32.totalorder %v28_v2, %v37_v8  ;;  %v2749_v53 = vld [vmem:[%s2959_s0 + $0xa0] sm:$0xff]   ;;  %v2759_v54 = vld [vmem:[%s2959_s0 + $0xa8] sm:$0xff]   ;;  %v2769_v55 = vld [vmem:[%s2959_s0 + $0xb0] sm:$0xff]  }
  0x1c   :  { %vm61_vm4 = vmand %vm39_vm0, %vm51_vm3  ;;  %vm50_vm6 = vcmp.lt.s32.totalorder %v28_v2, %v48_v9  ;;  %vm54_vm11 = vcmp.lt.s32.totalorder %v32_v7, %v48_v9  ;;  %vm47_vm13 = vcmp.ge.s32.totalorder %v32_v7, %v37_v8  ;;  %vm41_vm3 = vcmp.ge.s32.totalorder %v31_v11, %v36_v6  ;;  %v2781_v57 = vld [vmem:[%s2959_s0 + $0xb8] sm:$0xff]   ;;  %v2432_v62 = vld [vmem:[%s2959_s0 + $0xc0] sm:$0xff]  }
  0x1d   :  { %vm56_vm8 = vcmp.lt.s32.totalorder %v29_v4, %v49_v10  ;;  %v1926_v14 = vsel %vm61_vm4, 1.0, %v2489_v13  ;;  %vm55_vm9 = vcmp.lt.s32.totalorder %v28_v2, %v49_v10  ;;  %vm60_vm10 = vmand %vm38_vm1, %vm50_vm6  ;;  %vm59_vm14 = vcmp.lt.s32.totalorder %v32_v7, %v49_v10  ;;  %v2433_v4 = vld [vmem:[%s2959_s0 + $0xc8] sm:$0xff]  }
  0x1e   :  { %vm66_vm12 = vmand %vm44_vm2, %vm56_vm8  ;;  %v1925_v15 = vsel %vm60_vm10, 1.0, %v2489_v13  ;;  %vm53_vm7 = vcmp.lt.s32.totalorder %v31_v11, %v48_v9  ;;  %vm2962_vm4 = vcmp.ge.s32.totalorder %v32_v7, %v36_v6  ;;  %vm46_vm6 = vcmp.ge.s32.totalorder %v31_v11, %v37_v8 }
  0x1f   :  { %v1931_v16 = vsel %vm66_vm12, 1.0, %v2489_v13  ;;  %vm65_vm0 = vmand %vm43_vm5, %vm55_vm9  ;;  %vm58_vm2 = vcmp.lt.s32.totalorder %v31_v11, %v49_v10  ;;  %vm40_vm10 = vcmp.ge.s32.totalorder %v30_v12, %v36_v6  ;;  %vm52_vm12 = vcmp.lt.s32.totalorder %v30_v12, %v48_v9  ;;  %v2434_v9 = vld [vmem:[%s2959_s0 + $0xd0] sm:$0xff]  }
  0x20   :  { %v2525_v17 = vpack.c.bf16 %v1931_v16, %v1926_v14  ;;  %v1930_v18 = vsel %vm65_vm0, 1.0, %v2489_v13  ;;  %vm64_vm1 = vmand %vm2962_vm4, %vm54_vm11  ;;  %vm45_vm9 = vcmp.ge.s32.totalorder %v30_v12, %v37_v8  ;;  %vm57_vm11 = vcmp.lt.s32.totalorder %v30_v12, %v49_v10  ;;  %v2435_v14 = vld [vmem:[%s2959_s0 + $0xd8] sm:$0xff]  }
  0x21   :  { %v90_v19 = vpack.c.bf16 %v1930_v18, %v1925_v15  ;;  %vm69_vm8 = vmand %vm47_vm13, %vm59_vm14  ;;  %v1929_v21 = vsel %vm64_vm1, 1.0, %v2489_v13 }
  0x22   :  { %1964 = vmatprep.subr.msk.bf16.mxu0 %vm213_vm15, %v2525_v17  ;;  %2198 = vmatprep.subr.msk.bf16.mxu1 %vm213_vm15, %v2525_v17  ;;  %v1934_v22 = vsel %vm69_vm8, 1.0, %v2489_v13  ;;  %vm63_vm5 = vmand %vm41_vm3, %vm53_vm7  ;;  %vm182_vm7 = vcmask 97280  }
  0x23   :  { %v2540_v23 = vsel %vm213_vm15, %v90_v19, 0  ;;  %v2547_v25 = vpack.c.bf16 %v1934_v22, %v1929_v21  ;;  %vm68_vm13 = vmand %vm46_vm6, %vm58_vm2  ;;  %v1928_v26 = vsel %vm63_vm5, 1.0, %v2489_v13  ;;  %v2436_v19 = vld [vmem:[%s2959_s0 + $0xe0] ss:$0 sps:$4 sm:$0xff]   ;;  %s2490_s0 = smov [#allocation5]  }
  0x24   :  { %230 = vmatpush1.bf16.msra.mxu0 %v2540_v23  ;;  %2199 = vmatpush1.bf16.msra.mxu1 %v2540_v23  ;;  %v1933_v27 = vsel %vm68_vm13, 1.0, %v2489_v13  ;;  %vm62_vm14 = vmand %vm40_vm10, %vm52_vm12  ;;  %s1913_s28 = sshll.u32 %s2490_s0, 4  ;;  %s1914_s28 = int_to_ptr.vmem [resolvable:$true] %s1913_s28 }
  0x25   :  { %2398 = vmatprep.subr.msk.bf16.mxu0 %vm213_vm15, %v2547_v25  ;;  %v2559_v28 = vsel %vm213_vm15, %v2547_v25, 0  ;;  %v93_v29 = vpack.c.bf16 %v1933_v27, %v1928_v26  ;;  %vm67_vm0 = vmand %vm45_vm9, %vm57_vm11  ;;  %v1927_v30 = vsel %vm62_vm14, 1.0, %v2489_v13  ;;  %v1622_v27 = vld [vmem:[#allocation2] sm:$0xff]  ;;  %s2459_s29 = scalar_lea.vmem %s1914_s28, 12160  ;;  %p2464_p9 = scmp.lt.s32.totalorder %s1914_s28, %s1914_s28 }
  0x26   :  { %v1932_v31 = vsel %vm67_vm0, 1.0, %v2489_v13  ;;  %p2460_p8 = scmp.ne.s32.totalorder %s1914_s28, %s2459_s29  ;;  %p2465_p10 = scmp.lt.s32.totalorder %s2459_s29, %s2459_s29 }
  0x27   :  { %1965 = vmatmul.mubr.msk.bf16.vlgmr.msra.gmra.mrb[0].mxu0 %vm182_vm7, %v2531_v20  ;;  %1968 = vmatmul.mubr.msk.bf16.vlgmr.msra.gmra.mrb[0].mxu1 %vm182_vm7, %v2545_v24  ;;  %v92_v32 = vpack.c.bf16 %v1932_v31, %v1927_v30  ;;  %v1627_v30 = vld [vmem:[#allocation2 + $0x28] sm:$0xff] }
  0x28   :  { %2133 = vmatpush3.bf16.msra.mxu0 %v2559_v28  ;;  %271 = vmatprep.mubr.bf16.mxu0 %v2488_v1  ;;  %p2466_p11 = por %p2465_p10, %p2464_p9 }
  0x29   :  { %301 = vmatprep.mubr.bf16.mxu1 %v2488_v1  ;;  %1975 = vmatprep.subr.msk.bf16.mxu1 %vm213_vm15, %v93_v29  ;;  %v2571_v33 = vsel %vm213_vm15, %v92_v32, 0 }
  0x2a   :  { %361 = vmatpush1.bf16.msra.mxu1 %v2571_v33  ;;  %2006 = vmatprep.subr.msk.bf16.mxu0 %vm213_vm15, %v2525_v17  ;;  %p2467_p12 = pnand %p2466_p11, %p2460_p8 }
  0x2b   :  { %2017 = vmatprep.subr.msk.bf16.mxu1 %vm213_vm15, %v93_v29 }
  0x2f   :  { %1966 = vmatmul.mubr.msk.bf16.gmra.mrb[4].mxu0 %vm182_vm7, %v2409_v34  ;;  %1969 = vmatmul.mubr.msk.bf16.gmra.mrb[4].mxu1 %vm182_vm7, %v2410_v35 }
  0x30   :  { %281 = vmatprep.mubr.bf16.mxu0 %v2488_v1  ;;  %311 = vmatprep.mubr.bf16.mxu1 %v2488_v1 }
  0x37   :  { %1967 = vmatmul.mubr.msk.bf16.gmra.mrb[8].mxu0 %vm182_vm7, %v2411_v36  ;;  %1970 = vmatmul.mubr.msk.bf16.gmra.mrb[8].mxu1 %vm182_vm7, %v2412_v37 }
  0x38   :  { %321 = vmatprep.mubr.bf16.mxu1 %v2488_v1  ;;  %2134 = vmatprep.mubr.msk.bf16.mxu0 %vm182_vm7, %v2531_v20 }
  0x3f   :  { %1971 = vmatmul.mubr.msk.bf16.gmra.mrb[12].mxu1 %vm182_vm7, %v2413_v38  ;;  %2135 = vmatmul.mubr.msk.bf16.vlgmr.msra.gmra.mrb[12].mxu0 %vm182_vm7, %v2409_v34 }
  0x40   :  { %682 = vmatpush1.bf16.msra.mxu0 %v2540_v23  ;;  %331 = vmatprep.mubr.bf16.mxu1 %v2488_v1 }
  0x41   :  { %2138 = vmatprep.mubr.msk.bf16.mxu0 %vm182_vm7, %v2411_v36  ;;  %2399 = vmatprep.subr.msk.bf16.mxu0 %vm213_vm15, %v2547_v25 }
  0x47   :  { %1972 = vmatmul.mubr.msk.bf16.gmra.mrb[16].mxu1 %vm182_vm7, %v2414_v39  ;;  %2139 = vmatmul.mubr.msk.bf16.gmra.mrb[16].mxu0 %vm182_vm7, %v2545_v24 }
  0x48   :  { %341 = vmatprep.mubr.bf16.mxu1 %v2488_v1  ;;  %2142 = vmatprep.mubr.msk.bf16.mxu0 %vm182_vm7, %v2410_v35 }
  0x4f   :  { %1973 = vmatmul.mubr.msk.bf16.gmra.mrb[20].mxu1 %vm182_vm7, %v2415_v40  ;;  %2143 = vmatmul.mubr.msk.bf16.gmra.mrb[20].mxu0 %vm182_vm7, %v2412_v37 }
  0x50   :  { %351 = vmatprep.mubr.bf16.mxu1 %v2488_v1  ;;  %2146 = vmatprep.mubr.msk.bf16.mxu0 %vm182_vm7, %v2413_v38 }
  0x57   :  { %1974 = vmatmul.mubr.msk.bf16.gmra.mrb[24].mxu1 %vm182_vm7, %v2416_v41  ;;  %2147 = vmatmul.mubr.msk.bf16.gmra.mrb[24].mxu0 %vm182_vm7, %v2414_v39 }
  0x58   :  { %392 = vmatprep.mubr.bf16.mxu1 %v2488_v1  ;;  %2150 = vmatprep.mubr.msk.bf16.mxu0 %vm182_vm7, %v2415_v40 }
  0x5f   :  { %1976 = vmatmul.mubr.msk.bf16.vlgmr.msra.gmra.mrb[28].mxu1 %vm182_vm7, %v2531_v20  ;;  %2151 = vmatmul.mubr.msk.bf16.gmra.mrb[28].mxu0 %vm182_vm7, %v2416_v41 }
  0x60   :  { %402 = vmatprep.mubr.bf16.mxu1 %v2488_v1  ;;  %713 = vmatprep.mubr.bf16.mxu0 %v2488_v1 }
  0x61   :  { %813 = vmatpush1.bf16.msra.mxu1 %v2571_v33 }
  0x62   :  { %2078 = vmatprep.subr.msk.bf16.mxu1 %vm213_vm15, %v93_v29 }
  0x67   :  { %1977 = vmatmul.mubr.msk.bf16.gmra.mrb[32].mxu1 %vm182_vm7, %v2409_v34  ;;  %2007 = vmatmul.mubr.msk.bf16.vlgmr.msra.gmra.mrb[0].mxu0 %vm182_vm7, %v2417_v42 }
  0x68   :  { %2155 = vmatpush3.bf16.msra.mxu0 %v2559_v28  ;;  %412 = vmatprep.mubr.bf16.mxu1 %v2488_v1 }
  0x69   :  { %723 = vmatprep.mubr.bf16.mxu0 %v2488_v1  ;;  %2067 = vmatprep.subr.msk.bf16.mxu0 %vm213_vm15, %v2525_v17 }
  0x6f   :  { %1978 = vmatmul.mubr.msk.bf16.gmra.mrb[36].mxu1 %vm182_vm7, %v2411_v36  ;;  %2008 = vmatmul.mubr.msk.bf16.gmra.mrb[4].mxu0 %vm182_vm7, %v2418_v43 }
  0x70   :  { %422 = vmatprep.mubr.bf16.mxu1 %v2488_v1  ;;  %733 = vmatprep.mubr.bf16.mxu0 %v2488_v1 }
  0x77   :  { %1979 = vmatmul.mubr.msk.bf16.gmra.mrb[40].mxu1 %vm182_vm7, %v2545_v24  ;;  %2009 = vmatmul.mubr.msk.bf16.gmra.mrb[8].mxu0 %vm182_vm7, %v2419_v44 }
  0x78   :  { %432 = vmatprep.mubr.bf16.mxu1 %v2488_v1  ;;  %743 = vmatprep.mubr.bf16.mxu0 %v2488_v1 }
  0x7f   :  { %1980 = vmatmul.mubr.msk.bf16.gmra.mrb[44].mxu1 %vm182_vm7, %v2410_v35  ;;  %2010 = vmatmul.mubr.msk.bf16.gmra.mrb[32].mxu0 %vm182_vm7, %v2420_v45 }
  0x80   :  { %442 = vmatprep.mubr.bf16.mxu1 %v2488_v1  ;;  %753 = vmatprep.mubr.bf16.mxu0 %v2488_v1 }
  0x87   :  { %1981 = vmatmul.mubr.msk.bf16.gmra.mrb[48].mxu1 %vm182_vm7, %v2412_v37  ;;  %2011 = vmatmul.mubr.msk.bf16.gmra.mrb[36].mxu0 %vm182_vm7, %v2421_v46 }
  0x88   :  { %452 = vmatprep.mubr.bf16.mxu1 %v2488_v1  ;;  %763 = vmatprep.mubr.bf16.mxu0 %v2488_v1 }
  0x8f   :  { %1982 = vmatmul.mubr.msk.bf16.gmra.mrb[52].mxu1 %vm182_vm7, %v2413_v38  ;;  %2012 = vmatmul.mubr.msk.bf16.gmra.mrb[40].mxu0 %vm182_vm7, %v2422_v47  ;;  %v1632_v38 = vld [vmem:[#allocation2 + $0x50] sm:$0xff] }
  0x90   :  { %462 = vmatprep.mubr.bf16.mxu1 %v2488_v1  ;;  %773 = vmatprep.mubr.bf16.mxu0 %v2488_v1 }
  0x97   :  { %1983 = vmatmul.mubr.msk.bf16.gmra.mrb[56].mxu1 %vm182_vm7, %v2414_v39  ;;  %2013 = vmatmul.mubr.msk.bf16.gmra.mrb[44].mxu0 %vm182_vm7, %v2423_v48  ;;  %v1633_v39 = vld [vmem:[#allocation2 + $0x58] sm:$0xff] }
  0x98   :  { %472 = vmatprep.mubr.bf16.mxu1 %v2488_v1  ;;  %783 = vmatprep.mubr.bf16.mxu0 %v2488_v1 }
  0x9f   :  { %1984 = vmatmul.mubr.msk.bf16.gmra.mrb[60].mxu1 %vm182_vm7, %v2415_v40  ;;  %2014 = vmatmul.mubr.msk.bf16.gmra.mrb[48].mxu0 %vm182_vm7, %v2424_v49 }
  0xa0   :  { %482 = vmatprep.mubr.bf16.mxu1 %v2488_v1  ;;  %793 = vmatprep.mubr.bf16.mxu0 %v2488_v1 }
  0xa7   :  { %1985 = vmatmul.mubr.msk.bf16.gmra.mrb[64].mxu1 %vm182_vm7, %v2416_v41  ;;  %2015 = vmatmul.mubr.msk.bf16.gmra.mrb[52].mxu0 %vm182_vm7, %v2425_v50  ;;  %v1637_v41 = vld [vmem:[#allocation2 + $0x78] sm:$0xff] }
  0xa8   :  { %803 = vmatprep.mubr.bf16.mxu0 %v2488_v1  ;;  %844 = vmatprep.mubr.bf16.mxu1 %v2488_v1 }
  0xaf   :  { %2016 = vmatmul.mubr.msk.bf16.gmra.mrb[56].mxu0 %vm182_vm7, %v2426_v51  ;;  %2018 = vmatmul.mubr.msk.bf16.vlgmr.msra.gmra.mrb[28].mxu1 %vm182_vm7, %v2417_v42 }
  0xb0   :  { %854 = vmatprep.mubr.bf16.mxu1 %v2488_v1  ;;  %2156 = vmatprep.mubr.msk.bf16.mxu0 %vm182_vm7, %v2417_v42 }
  0xb1   :  { %1285 = vmatpush1.bf16.msra.mxu1 %v2571_v33  ;;  %v1628_v33 = vld [vmem:[#allocation2 + $0x30] sm:$0xff] }
  0xb7   :  { %2019 = vmatmul.mubr.msk.bf16.gmra.mrb[32].mxu1 %vm182_vm7, %v2418_v43  ;;  %2157 = vmatmul.mubr.msk.bf16.vlgmr.msra.gmra.mrb[12].mxu0 %vm182_vm7, %v2418_v43 }
  0xb8   :  { %1154 = vmatpush1.bf16.msra.mxu0 %v2540_v23  ;;  %864 = vmatprep.mubr.bf16.mxu1 %v2488_v1 }
  0xb9   :  { %2160 = vmatprep.mubr.msk.bf16.mxu0 %vm182_vm7, %v2419_v44  ;;  %2400 = vmatprep.subr.msk.bf16.mxu0 %vm213_vm15, %v2547_v25  ;;  %vm1816_vm15 = vcmask 621568  }
  0xbf   :  { %2020 = vmatmul.mubr.msk.bf16.gmra.mrb[36].mxu1 %vm182_vm7, %v2419_v44  ;;  %2161 = vmatmul.mubr.msk.bf16.gmra.mrb[16].mxu0 %vm182_vm7, %v2420_v45  ;;  %v1638_v44 = vld [vmem:[#allocation2 + $0x80] sm:$0xff] }
  0xc0   :  { %874 = vmatprep.mubr.bf16.mxu1 %v2488_v1  ;;  %2164 = vmatprep.mubr.msk.bf16.mxu0 %vm182_vm7, %v2421_v46 }
  0xc7   :  { %2021 = vmatmul.mubr.msk.bf16.gmra.mrb[40].mxu1 %vm182_vm7, %v2420_v45  ;;  %2165 = vmatmul.mubr.msk.bf16.gmra.mrb[20].mxu0 %vm182_vm7, %v2422_v47 }
  0xc8   :  { %884 = vmatprep.mubr.bf16.mxu1 %v2488_v1  ;;  %2168 = vmatprep.mubr.msk.bf16.mxu0 %vm182_vm7, %v2423_v48 }
  0xcf   :  { %2022 = vmatmul.mubr.msk.bf16.gmra.mrb[44].mxu1 %vm182_vm7, %v2421_v46  ;;  %2169 = vmatmul.mubr.msk.bf16.gmra.mrb[24].mxu0 %vm182_vm7, %v2424_v49 }
  0xd0   :  { %894 = vmatprep.mubr.bf16.mxu1 %v2488_v1  ;;  %2172 = vmatprep.mubr.msk.bf16.mxu0 %vm182_vm7, %v2425_v50 }
  0xd7   :  { %2023 = vmatmul.mubr.msk.bf16.gmra.mrb[48].mxu1 %vm182_vm7, %v2422_v47  ;;  %2173 = vmatmul.mubr.msk.bf16.gmra.mrb[28].mxu0 %vm182_vm7, %v2426_v51 }
  0xd8   :  { %904 = vmatprep.mubr.bf16.mxu1 %v2488_v1  ;;  %1185 = vmatprep.mubr.bf16.mxu0 %v2488_v1 }
  0xdf   :  { %2024 = vmatmul.mubr.msk.bf16.gmra.mrb[52].mxu1 %vm182_vm7, %v2423_v48  ;;  %2068 = vmatmul.mubr.msk.bf16.vlgmr.msra.gmra.mrb[0].mxu0 %vm182_vm7, %v2738_v52 }
  0xe0   :  { %2177 = vmatpush3.bf16.msra.mxu0 %v2559_v28  ;;  %914 = vmatprep.mubr.bf16.mxu1 %v2488_v1  ;;  %v1623_v28 = vld [vmem:[#allocation2 + $0x8] sm:$0xff] }
  0xe1   :  { %1195 = vmatprep.mubr.bf16.mxu0 %v2488_v1 }
  0xe7   :  { %2025 = vmatmul.mubr.msk.bf16.gmra.mrb[56].mxu1 %vm182_vm7, %v2424_v49  ;;  %2069 = vmatmul.mubr.msk.bf16.gmra.mrb[4].mxu0 %vm182_vm7, %v2749_v53 }
  0xe8   :  { %924 = vmatprep.mubr.bf16.mxu1 %v2488_v1  ;;  %1205 = vmatprep.mubr.bf16.mxu0 %v2488_v1 }
  0xef   :  { %2026 = vmatmul.mubr.msk.bf16.gmra.mrb[60].mxu1 %vm182_vm7, %v2425_v50  ;;  %2070 = vmatmul.mubr.msk.bf16.gmra.mrb[8].mxu0 %vm182_vm7, %v2759_v54  ;;  %v1642_v50 = vld [vmem:[#allocation2 + $0xa0] sm:$0xff] }
  0xf0   :  { %934 = vmatprep.mubr.bf16.mxu1 %v2488_v1  ;;  %1215 = vmatprep.mubr.bf16.mxu0 %v2488_v1 }
  0xf7   :  { %2027 = vmatmul.mubr.msk.bf16.gmra.mrb[64].mxu1 %vm182_vm7, %v2426_v51  ;;  %2071 = vmatmul.mubr.msk.bf16.gmra.mrb[32].mxu0 %vm182_vm7, %v2769_v55  ;;  %v1643_v51 = vld [vmem:[#allocation2 + $0xa8] sm:$0xff] }
  0xf8   :  { %1225 = vmatprep.mubr.bf16.mxu0 %v2488_v1  ;;  %1316 = vmatprep.mubr.bf16.mxu1 %v2488_v1 }
  0xfa   :  { %v2776_v56 = vpop.f32.mrb[0].mxu1 }
  0xfb   :  { %v2783_v58 = vpop.f32.mrb[1].mxu1 }
  0xfc   :  { %v2785_v59 = vpop.f32.mrb[2].mxu1 }
  0xfd   :  { %v2787_v60 = vpop.f32.mrb[3].mxu1 }
  0xff   :  { %2072 = vmatmul.mubr.msk.bf16.gmra.mrb[36].mxu0 %vm182_vm7, %v2781_v57  ;;  %2079 = vmatmul.mubr.msk.bf16.vlgmr.msra.gmra.mrb[28].mxu1 %vm182_vm7, %v2738_v52 }
 0x100   :  { %1235 = vmatprep.mubr.bf16.mxu0 %v2488_v1  ;;  %1326 = vmatprep.mubr.bf16.mxu1 %v2488_v1 }
 0x102   :  { %v2795_v61 = vpop.f32.mrb[4].mxu1 }
 0x103   :  { %v2800_v63 = vpop.f32.mrb[5].mxu1 }
 0x104   :  { %v2802_v0 = vpop.f32.mrb[6].mxu1 }
 0x105   :  { %v2804_v2 = vpop.f32.mrb[7].mxu1 }
 0x107   :  { %2073 = vmatmul.mubr.msk.bf16.gmra.mrb[40].mxu0 %vm182_vm7, %v2432_v62  ;;  %2080 = vmatmul.mubr.msk.bf16.gmra.mrb[32].mxu1 %vm182_vm7, %v2749_v53 }
 0x108   :  { %1245 = vmatprep.mubr.bf16.mxu0 %v2488_v1  ;;  %1336 = vmatprep.mubr.bf16.mxu1 %v2488_v1 }
 0x10a   :  { %v2811_v3 = vpop.f32.mrb[8].mxu1 }
 0x10b   :  { %v2816_v5 = vpop.f32.mrb[9].mxu1 }
 0x10c   :  { %v2818_v6 = vpop.f32.mrb[10].mxu1 }
 0x10d   :  { %v2820_v7 = vpop.f32.mrb[11].mxu1 }
 0x10f   :  { %2074 = vmatmul.mubr.msk.bf16.gmra.mrb[44].mxu0 %vm182_vm7, %v2433_v4  ;;  %2081 = vmatmul.mubr.msk.bf16.gmra.mrb[36].mxu1 %vm182_vm7, %v2759_v54 }
 0x110   :  { %1255 = vmatprep.mubr.bf16.mxu0 %v2488_v1  ;;  %1346 = vmatprep.mubr.bf16.mxu1 %v2488_v1 }
 0x112   :  { %v2827_v8 = vpop.f32.mrb[12].mxu1 }
 0x113   :  { %v2832_v10 = vpop.f32.mrb[13].mxu1 }
 0x114   :  { %v2834_v11 = vpop.f32.mrb[14].mxu1 }
 0x115   :  { %v2836_v12 = vpop.f32.mrb[15].mxu1 }
 0x117   :  { %2075 = vmatmul.mubr.msk.bf16.gmra.mrb[48].mxu0 %vm182_vm7, %v2434_v9  ;;  %2082 = vmatmul.mubr.msk.bf16.gmra.mrb[40].mxu1 %vm182_vm7, %v2769_v55 }
 0x118   :  { %1265 = vmatprep.mubr.bf16.mxu0 %v2488_v1  ;;  %1356 = vmatprep.mubr.bf16.mxu1 %v2488_v1 }
 0x11a   :  { %v2843_v13 = vpop.f32.mrb[16].mxu1 }
 0x11b   :  { %v2848_v15 = vpop.f32.mrb[17].mxu1 }
 0x11c   :  { %v2850_v16 = vpop.f32.mrb[18].mxu1 }
 0x11d   :  { %v2852_v17 = vpop.f32.mrb[19].mxu1 }
 0x11f   :  { %2076 = vmatmul.mubr.msk.bf16.gmra.mrb[52].mxu0 %vm182_vm7, %v2435_v14  ;;  %2083 = vmatmul.mubr.msk.bf16.gmra.mrb[44].mxu1 %vm182_vm7, %v2781_v57 }
 0x120   :  { %1275 = vmatprep.mubr.bf16.mxu0 %v2488_v1  ;;  %1366 = vmatprep.mubr.bf16.mxu1 %v2488_v1 }
 0x122   :  { %v2859_v18 = vpop.f32.mrb[20].mxu1 }
 0x123   :  { %v2864_v20 = vpop.f32.mrb[21].mxu1 }
 0x124   :  { %v2866_v21 = vpop.f32.mrb[22].mxu1 }
 0x125   :  { %v2868_v22 = vpop.f32.mrb[23].mxu1 }
 0x127   :  { %2077 = vmatmul.mubr.msk.bf16.gmra.mrb[56].mxu0 %vm182_vm7, %v2436_v19  ;;  %2084 = vmatmul.mubr.msk.bf16.gmra.mrb[48].mxu1 %vm182_vm7, %v2432_v62 }
 0x128   :  { %1376 = vmatprep.mubr.bf16.mxu1 %v2488_v1  ;;  %2178 = vmatprep.mubr.msk.bf16.mxu0 %vm182_vm7, %v2738_v52 }
 0x12a   :  { %v2875_v23 = vpop.f32.mrb[24].mxu1 }
 0x12b   :  { %v2877_v24 = vpop.f32.mrb[25].mxu1 }
 0x12c   :  { %v357_v25 = vpop.f32.mrb[26].mxu1 }
 0x12d   :  { %v358_v26 = vpop.f32.mrb[27].mxu1 }
 0x12e   :  { %v1652_v26 = vld [vmem:[#allocation2 + $0xf0] sm:$0xff] }
 0x12f   :  { %2085 = vmatmul.mubr.msk.bf16.gmra.mrb[52].mxu1 %vm182_vm7, %v2433_v4  ;;  %2179 = vmatmul.mubr.msk.bf16.vlgmr.msra.gmra.mrb[12].mxu0 %vm182_vm7, %v2749_v53  ;;  %v1647_v53 = vld [vmem:[#allocation2 + $0xc8] sm:$0xff] }
 0x130   :  { %1386 = vmatprep.mubr.bf16.mxu1 %v2488_v1  ;;  %2182 = vmatprep.mubr.msk.bf16.mxu0 %vm182_vm7, %v2759_v54 }
 0x137   :  { %2086 = vmatmul.mubr.msk.bf16.gmra.mrb[56].mxu1 %vm182_vm7, %v2434_v9  ;;  %2183 = vmatmul.mubr.msk.bf16.gmra.mrb[16].mxu0 %vm182_vm7, %v2769_v55 }
 0x138   :  { %1396 = vmatprep.mubr.bf16.mxu1 %v2488_v1  ;;  %2186 = vmatprep.mubr.msk.bf16.mxu0 %vm182_vm7, %v2781_v57  ;;  %v1648_v57 = vld [vmem:[#allocation2 + $0xd0] sm:$0xff] }
 0x13f   :  { %2087 = vmatmul.mubr.msk.bf16.gmra.mrb[60].mxu1 %vm182_vm7, %v2435_v14  ;;  %2187 = vmatmul.mubr.msk.bf16.gmra.mrb[20].mxu0 %vm182_vm7, %v2432_v62 }
 0x140   :  { %1406 = vmatprep.mubr.bf16.mxu1 %v2488_v1  ;;  %2190 = vmatprep.mubr.msk.bf16.mxu0 %vm182_vm7, %v2433_v4 }
 0x147   :  { %2088 = vmatmul.mubr.msk.bf16.gmra.mrb[64].mxu1 %vm182_vm7, %v2436_v19  ;;  %2191 = vmatmul.mubr.msk.bf16.gmra.mrb[24].mxu0 %vm182_vm7, %v2434_v9 }
 0x148   :  { %2194 = vmatprep.mubr.msk.bf16.mxu0 %vm182_vm7, %v2435_v14 }
 0x14f   :  { %2195 = vmatmul.mubr.msk.bf16.gmra.mrb[28].mxu0 %vm182_vm7, %v2436_v19 }
 0x1b2   :  { %v1187_v29 = vpop.f32.mrb[0].mxu0 }
 0x1b3   :  { %v1717_v31 = vmul.f32 %v1622_v27, %v1187_v29  ;;  %v1189_v32 = vpop.f32.mrb[1].mxu0  ;;  %v1653_v29 = vld [vmem:[#allocation2 + $0xf8] sm:$0xff] }
 0x1b4   :  { %v1718_v34 = vmul.f32 %v1623_v28, %v1189_v32  ;;  %v1191_v35 = vpop.f32.mrb[2].mxu0  ;;  %v1657_v32 = vld [vmem:[#allocation2 + $0x118] sm:$0xff] }
 0x1b5   :  { %1812 = vst [vmem:[#allocation5] sm:$0xff] %v1717_v31  ;;  %v1722_v1 = vmul.f32 %v1627_v30, %v1191_v35  ;;  %v1193_v36 = vpop.f32.mrb[3].mxu0 }
 0x1b6   :  { %1813 = vst [vmem:[#allocation5 + $0x8] sm:$0xff] %v1718_v34  ;;  %v1723_v37 = vmul.f32 %v1628_v33, %v1193_v36 }
 0x1b7   :  { %1818 = vst [vmem:[#allocation5 + $0x28] sm:$0xff] %v1722_v1  ;;  %v1658_v1 = vld [vmem:[#allocation2 + $0x120] sm:$0xff] }
 0x1b8   :  { %1819 = vst [vmem:[#allocation5 + $0x30] sm:$0xff] %v1723_v37 }
 0x1ba   :  { %v1197_v40 = vpop.f32.mrb[4].mxu0 }
 0x1bb   :  { %v1727_v42 = vmul.f32 %v1632_v38, %v1197_v40  ;;  %v1199_v43 = vpop.f32.mrb[5].mxu0  ;;  %v1624_v40 = vld [vmem:[#allocation2 + $0x10] sm:$0xff] }
 0x1bc   :  { %v1728_v45 = vmul.f32 %v1633_v39, %v1199_v43  ;;  %v1201_v46 = vpop.f32.mrb[6].mxu0  ;;  %v1629_v43 = vld [vmem:[#allocation2 + $0x38] sm:$0xff] }
 0x1bd   :  { %1823 = vst [vmem:[#allocation5 + $0x50] sm:$0xff] %v1727_v42  ;;  %v1732_v47 = vmul.f32 %v1637_v41, %v1201_v46  ;;  %v1203_v48 = vpop.f32.mrb[7].mxu0  ;;  %v1663_v46 = vld [vmem:[#allocation2 + $0x148] sm:$0xff] }
 0x1be   :  { %1824 = vst [vmem:[#allocation5 + $0x58] sm:$0xff] %v1728_v45  ;;  %v1733_v49 = vmul.f32 %v1638_v44, %v1203_v48  ;;  %v1630_v48 = vld [vmem:[#allocation2 + $0x40] sm:$0xff] }
 0x1bf   :  { %1828 = vst [vmem:[#allocation5 + $0x78] sm:$0xff] %v1732_v47 }
 0x1c0   :  { %1829 = vst [vmem:[#allocation5 + $0x80] sm:$0xff] %v1733_v49 }
 0x1c2   :  { %v1207_v52 = vpop.f32.mrb[8].mxu0 }
 0x1c3   :  { %v1737_v54 = vmul.f32 %v1642_v50, %v1207_v52  ;;  %v1209_v55 = vpop.f32.mrb[9].mxu0 }
 0x1c4   :  { %v1738_v62 = vmul.f32 %v1643_v51, %v1209_v55  ;;  %v1211_v4 = vpop.f32.mrb[10].mxu0  ;;  %v1667_v51 = vld [vmem:[#allocation2 + $0x168] sm:$0xff] }
 0x1c5   :  { %1833 = vst [vmem:[#allocation5 + $0xa0] sm:$0xff] %v1737_v54  ;;  %v1742_v9 = vmul.f32 %v1647_v53, %v1211_v4  ;;  %v1213_v14 = vpop.f32.mrb[11].mxu0 }
 0x1c6   :  { %1834 = vst [vmem:[#allocation5 + $0xa8] sm:$0xff] %v1738_v62  ;;  %v1743_v19 = vmul.f32 %v1648_v57, %v1213_v14  ;;  %v1668_v62 = vld [vmem:[#allocation2 + $0x170] sm:$0xff] }
 0x1c7   :  { %1838 = vst [vmem:[#allocation5 + $0xc8] sm:$0xff] %v1742_v9 }
 0x1c8   :  { %1839 = vst [vmem:[#allocation5 + $0xd0] sm:$0xff] %v1743_v19 }
 0x1ca   :  { %v1217_v25 = vpop.f32.mrb[32].mxu0 }
 0x1cb   :  { %v2200_v27 = vadd.f32 %v1217_v25, %v2776_v56  ;;  %v1219_v28 = vpop.f32.mrb[33].mxu0  ;;  %v1625_v56 = vld [vmem:[#allocation2 + $0x18] sm:$0xff]  ;;  %v1634_v25 = vld [vmem:[#allocation2 + $0x60] sm:$0xff] }
 0x1cc   :  { %v2201_v30 = vadd.f32 %v1219_v28, %v2783_v58  ;;  %v1221_v31 = vpop.f32.mrb[34].mxu0  ;;  %v1662_v58 = vld [vmem:[#allocation2 + $0x140] sm:$0xff] }
 0x1cd   :  { %v1747_v33 = vmul.f32 %v2200_v27, %v1652_v26  ;;  %v2202_v34 = vadd.f32 %v1221_v31, %v2785_v59  ;;  %v1223_v35 = vpop.f32.mrb[35].mxu0  ;;  %v1635_v26 = vld [vmem:[#allocation2 + $0x68] sm:$0xff]  ;;  %v1672_v27 = vld [vmem:[#allocation2 + $0x190] sm:$0xff] }
 0x1ce   :  { %v1748_v36 = vmul.f32 %v2201_v30, %v1653_v29  ;;  %v2203_v37 = vadd.f32 %v1223_v35, %v2787_v60  ;;  %v1639_v29 = vld [vmem:[#allocation2 + $0x88] sm:$0xff] }
 0x1cf   :  { %1843 = vst [vmem:[#allocation5 + $0xf0] sm:$0xff] %v1747_v33  ;;  %v1752_v38 = vmul.f32 %v2202_v34, %v1657_v32  ;;  %v1640_v34 = vld [vmem:[#allocation2 + $0x90] sm:$0xff] }
 0x1d0   :  { %1844 = vst [vmem:[#allocation5 + $0xf8] sm:$0xff] %v1748_v36  ;;  %v1753_v39 = vmul.f32 %v2203_v37, %v1658_v1  ;;  %v1677_v37 = vld [vmem:[#allocation2 + $0x1b8] sm:$0xff] }
 0x1d1   :  { %1848 = vst [vmem:[#allocation5 + $0x118] sm:$0xff] %v1752_v38 }
 0x1d2   :  { %1849 = vst [vmem:[#allocation5 + $0x120] sm:$0xff] %v1753_v39  ;;  %v1227_v41 = vpop.f32.mrb[36].mxu0  ;;  %v1318_v42 = vpop.f32.mrb[28].mxu1 }
 0x1d3   :  { %v2204_v44 = vadd.f32 %v1227_v41, %v2795_v61  ;;  %v1719_v59 = vmul.f32 %v1624_v40, %v1318_v42  ;;  %v1229_v45 = vpop.f32.mrb[37].mxu0  ;;  %v1320_v47 = vpop.f32.mrb[29].mxu1 }
 0x1d4   :  { %v2205_v60 = vadd.f32 %v1229_v45, %v2800_v63  ;;  %v1720_v49 = vmul.f32 %v1625_v56, %v1320_v47  ;;  %v1231_v50 = vpop.f32.mrb[38].mxu0  ;;  %v1322_v52 = vpop.f32.mrb[30].mxu1  ;;  %v1644_v45 = vld [vmem:[#allocation2 + $0xb0] sm:$0xff]  ;;  %v1682_v47 = vld [vmem:[#allocation2 + $0x1e0] sm:$0xff] }
 0x1d5   :  { %v1757_v53 = vmul.f32 %v2204_v44, %v1662_v58  ;;  %1814 = vst [vmem:[#allocation5 + $0x10] sm:$0xff] %v1719_v59  ;;  %v2206_v54 = vadd.f32 %v1231_v50, %v2802_v0  ;;  %v1724_v55 = vmul.f32 %v1629_v43, %v1322_v52  ;;  %v1233_v57 = vpop.f32.mrb[39].mxu0  ;;  %v1324_v4 = vpop.f32.mrb[31].mxu1  ;;  %v1678_v58 = vld [vmem:[#allocation2 + $0x1c0] sm:$0xff] }
 0x1d6   :  { %v1758_v61 = vmul.f32 %v2205_v60, %v1663_v46  ;;  %1815 = vst [vmem:[#allocation5 + $0x18] sm:$0xff] %v1720_v49  ;;  %v2207_v9 = vadd.f32 %v1233_v57, %v2804_v2  ;;  %v1725_v14 = vmul.f32 %v1630_v48, %v1324_v4  ;;  %v1673_v2 = vld [vmem:[#allocation2 + $0x198] sm:$0xff] }
 0x1d7   :  { %1853 = vst [vmem:[#allocation5 + $0x140] sm:$0xff] %v1757_v53  ;;  %v1762_v19 = vmul.f32 %v2206_v54, %v1667_v51  ;;  %1820 = vst [vmem:[#allocation5 + $0x38] sm:$0xff] %v1724_v55  ;;  %v1645_v46 = vld [vmem:[#allocation2 + $0xb8] sm:$0xff]  ;;  %v1650_v53 = vld [vmem:[#allocation2 + $0xe0] sm:$0xff] }
 0x1d8   :  { %1854 = vst [vmem:[#allocation5 + $0x148] sm:$0xff] %v1758_v61  ;;  %v1763_v63 = vmul.f32 %v2207_v9, %v1668_v62  ;;  %1821 = vst [vmem:[#allocation5 + $0x40] sm:$0xff] %v1725_v14  ;;  %v1649_v60 = vld [vmem:[#allocation2 + $0xd8] sm:$0xff]  ;;  %v1687_v62 = vld [vmem:[#allocation2 + $0x208] sm:$0xff] }
 0x1d9   :  { %1858 = vst [vmem:[#allocation5 + $0x168] sm:$0xff] %v1762_v19 }
 0x1da   :  { %1859 = vst [vmem:[#allocation5 + $0x170] sm:$0xff] %v1763_v63  ;;  %v1237_v0 = vpop.f32.mrb[40].mxu0  ;;  %v1328_v28 = vpop.f32.mrb[32].mxu1  ;;  %v1688_v63 = vld [vmem:[#allocation2 + $0x210] sm:$0xff] }
 0x1db   :  { %v2208_v30 = vadd.f32 %v1237_v0, %v2811_v3  ;;  %v1729_v31 = vmul.f32 %v1634_v25, %v1328_v28  ;;  %v1239_v32 = vpop.f32.mrb[41].mxu0  ;;  %v1330_v33 = vpop.f32.mrb[33].mxu1  ;;  %v1654_v28 = vld [vmem:[#allocation2 + $0x100] sm:$0xff] }
 0x1dc   :  { %v2209_v35 = vadd.f32 %v1239_v32, %v2816_v5  ;;  %v1730_v1 = vmul.f32 %v1635_v26, %v1330_v33  ;;  %v1241_v36 = vpop.f32.mrb[42].mxu0  ;;  %v1332_v38 = vpop.f32.mrb[34].mxu1  ;;  %v1659_v32 = vld [vmem:[#allocation2 + $0x128] sm:$0xff] }
 0x1dd   :  { %v1767_v39 = vmul.f32 %v2208_v30, %v1672_v27  ;;  %1825 = vst [vmem:[#allocation5 + $0x60] sm:$0xff] %v1729_v31  ;;  %v2210_v40 = vadd.f32 %v1241_v36, %v2818_v6  ;;  %v1734_v56 = vmul.f32 %v1639_v29, %v1332_v38  ;;  %v1243_v41 = vpop.f32.mrb[43].mxu0  ;;  %v1334_v42 = vpop.f32.mrb[35].mxu1  ;;  %v1655_v29 = vld [vmem:[#allocation2 + $0x108] sm:$0xff]  ;;  %v1692_v30 = vld [vmem:[#allocation2 + $0x230] sm:$0xff] }
 0x1de   :  { %v1768_v3 = vmul.f32 %v2209_v35, %v1673_v2  ;;  %1826 = vst [vmem:[#allocation5 + $0x68] sm:$0xff] %v1730_v1  ;;  %v2211_v43 = vadd.f32 %v1243_v41, %v2820_v7  ;;  %v1735_v44 = vmul.f32 %v1640_v34, %v1334_v42  ;;  %v1683_v7 = vld [vmem:[#allocation2 + $0x1e8] sm:$0xff]  ;;  %v1660_v1 = vld [vmem:[#allocation2 + $0x130] sm:$0xff] }
 0x1df   :  { %1863 = vst [vmem:[#allocation5 + $0x190] sm:$0xff] %v1767_v39  ;;  %v1772_v59 = vmul.f32 %v2210_v40, %v1677_v37  ;;  %1830 = vst [vmem:[#allocation5 + $0x88] sm:$0xff] %v1734_v56  ;;  %v1697_v39 = vld [vmem:[#allocation2 + $0x258] sm:$0xff] }
 0x1e0   :  { %1864 = vst [vmem:[#allocation5 + $0x198] sm:$0xff] %v1768_v3  ;;  %v1773_v5 = vmul.f32 %v2211_v43, %v1678_v58  ;;  %1831 = vst [vmem:[#allocation5 + $0x90] sm:$0xff] %v1735_v44  ;;  %v1698_v3 = vld [vmem:[#allocation2 + $0x260] sm:$0xff] }
 0x1e1   :  { %1868 = vst [vmem:[#allocation5 + $0x1b8] sm:$0xff] %v1772_v59 }
 0x1e2   :  { %1869 = vst [vmem:[#allocation5 + $0x1c0] sm:$0xff] %v1773_v5  ;;  %v1247_v6 = vpop.f32.mrb[44].mxu0  ;;  %v1338_v48 = vpop.f32.mrb[36].mxu1 }
 0x1e3   :  { %v2212_v49 = vadd.f32 %v1247_v6, %v2827_v8  ;;  %v1739_v50 = vmul.f32 %v1644_v45, %v1338_v48  ;;  %v1249_v51 = vpop.f32.mrb[45].mxu0  ;;  %v1340_v52 = vpop.f32.mrb[37].mxu1  ;;  %v1664_v45 = vld [vmem:[#allocation2 + $0x150] sm:$0xff]  ;;  %v1702_v6 = vld [vmem:[#allocation2 + $0x280] sm:$0xff]  ;;  %v1669_v48 = vld [vmem:[#allocation2 + $0x178] sm:$0xff] }
 0x1e4   :  { %v2213_v54 = vadd.f32 %v1249_v51, %v2832_v10  ;;  %v1740_v55 = vmul.f32 %v1645_v46, %v1340_v52  ;;  %v1251_v57 = vpop.f32.mrb[46].mxu0  ;;  %v1342_v4 = vpop.f32.mrb[38].mxu1  ;;  %v1665_v46 = vld [vmem:[#allocation2 + $0x158] sm:$0xff] }
 0x1e5   :  { %v1777_v61 = vmul.f32 %v2212_v49, %v1682_v47  ;;  %1835 = vst [vmem:[#allocation5 + $0xb0] sm:$0xff] %v1739_v50  ;;  %v2214_v9 = vadd.f32 %v1251_v57, %v2834_v11  ;;  %v1744_v14 = vmul.f32 %v1649_v60, %v1342_v4  ;;  %v1253_v19 = vpop.f32.mrb[47].mxu0  ;;  %v1344_v25 = vpop.f32.mrb[39].mxu1 }
 0x1e6   :  { %v1778_v8 = vmul.f32 %v2213_v54, %v1683_v7  ;;  %1836 = vst [vmem:[#allocation5 + $0xb8] sm:$0xff] %v1740_v55  ;;  %v2215_v26 = vadd.f32 %v1253_v19, %v2836_v12  ;;  %v1745_v0 = vmul.f32 %v1650_v53, %v1344_v25  ;;  %v1693_v12 = vld [vmem:[#allocation2 + $0x238] sm:$0xff]  ;;  %v1670_v7 = vld [vmem:[#allocation2 + $0x180] sm:$0xff]  ;;  %v1707_v55 = vld [vmem:[#allocation2 + $0x2a8] sm:$0xff] }
 0x1e7   :  { %1873 = vst [vmem:[#allocation5 + $0x1e0] sm:$0xff] %v1777_v61  ;;  %v1782_v27 = vmul.f32 %v2214_v9, %v1687_v62  ;;  %1840 = vst [vmem:[#allocation5 + $0xd8] sm:$0xff] %v1744_v14  ;;  %v1708_v14 = vld [vmem:[#allocation2 + $0x2b0] sm:$0xff] }
 0x1e8   :  { %1874 = vst [vmem:[#allocation5 + $0x1e8] sm:$0xff] %v1778_v8  ;;  %v1783_v10 = vmul.f32 %v2215_v26, %v1688_v63  ;;  %1841 = vst [vmem:[#allocation5 + $0xe0] sm:$0xff] %v1745_v0  ;;  %v1674_v26 = vld [vmem:[#allocation2 + $0x1a0] sm:$0xff]  ;;  %v1675_v0 = vld [vmem:[#allocation2 + $0x1a8] sm:$0xff] }
 0x1e9   :  { %1878 = vst [vmem:[#allocation5 + $0x208] sm:$0xff] %v1782_v27  ;;  %v1712_v27 = vld [vmem:[#allocation2 + $0x2d0] sm:$0xff] }
 0x1ea   :  { %1879 = vst [vmem:[#allocation5 + $0x210] sm:$0xff] %v1783_v10  ;;  %v1257_v11 = vpop.f32.mrb[48].mxu0  ;;  %v1348_v31 = vpop.f32.mrb[40].mxu1 }
 0x1eb   :  { %v2216_v2 = vadd.f32 %v1257_v11, %v2843_v13  ;;  %v1749_v33 = vmul.f32 %v1654_v28, %v1348_v31  ;;  %v1259_v34 = vpop.f32.mrb[49].mxu0  ;;  %v1350_v35 = vpop.f32.mrb[41].mxu1  ;;  %v1679_v28 = vld [vmem:[#allocation2 + $0x1c8] sm:$0xff] }
 0x1ec   :  { %v2217_v36 = vadd.f32 %v1259_v34, %v2848_v15  ;;  %v1750_v37 = vmul.f32 %v1655_v29, %v1350_v35  ;;  %v1261_v38 = vpop.f32.mrb[50].mxu0  ;;  %v1352_v40 = vpop.f32.mrb[42].mxu1 }
 0x1ed   :  { %v1787_v56 = vmul.f32 %v2216_v2, %v1692_v30  ;;  %1845 = vst [vmem:[#allocation5 + $0x100] sm:$0xff] %v1749_v33  ;;  %v2218_v41 = vadd.f32 %v1261_v38, %v2850_v16  ;;  %v1754_v58 = vmul.f32 %v1659_v32, %v1352_v40  ;;  %v1263_v42 = vpop.f32.mrb[51].mxu0  ;;  %v1354_v43 = vpop.f32.mrb[43].mxu1  ;;  %v1680_v32 = vld [vmem:[#allocation2 + $0x1d0] sm:$0xff] }
 0x1ee   :  { %v1788_v13 = vmul.f32 %v2217_v36, %v1693_v12  ;;  %1846 = vst [vmem:[#allocation5 + $0x108] sm:$0xff] %v1750_v37  ;;  %v2219_v44 = vadd.f32 %v1263_v42, %v2852_v17  ;;  %v1755_v59 = vmul.f32 %v1660_v1, %v1354_v43  ;;  %v1703_v17 = vld [vmem:[#allocation2 + $0x288] sm:$0xff]  ;;  %v1636_v40 = vld [vmem:[#allocation2 + $0x70] sm:$0xff]  ;;  %v1689_v42 = vld [vmem:[#allocation2 + $0x218] sm:$0xff] }
 0x1ef   :  { %1883 = vst [vmem:[#allocation5 + $0x230] sm:$0xff] %v1787_v56  ;;  %v1792_v5 = vmul.f32 %v2218_v41, %v1697_v39  ;;  %1850 = vst [vmem:[#allocation5 + $0x128] sm:$0xff] %v1754_v58  ;;  %v1685_v56 = vld [vmem:[#allocation2 + $0x1f8] sm:$0xff]  ;;  %v1626_v41 = vld [vmem:[#allocation2 + $0x20] sm:$0xff] }
 0x1f0   :  { %1884 = vst [vmem:[#allocation5 + $0x238] sm:$0xff] %v1788_v13  ;;  %v1793_v15 = vmul.f32 %v2219_v44, %v1698_v3  ;;  %1851 = vst [vmem:[#allocation5 + $0x130] sm:$0xff] %v1755_v59  ;;  %v1641_v3 = vld [vmem:[#allocation2 + $0x98] sm:$0xff] }
 0x1f1   :  { %1888 = vst [vmem:[#allocation5 + $0x258] sm:$0xff] %v1792_v5  ;;  %v1690_v5 = vld [vmem:[#allocation2 + $0x220] sm:$0xff] }
 0x1f2   :  { %1889 = vst [vmem:[#allocation5 + $0x260] sm:$0xff] %v1793_v15  ;;  %v1267_v16 = vpop.f32.mrb[52].mxu0  ;;  %v1358_v47 = vpop.f32.mrb[44].mxu1  ;;  %v1631_v15 = vld [vmem:[#allocation2 + $0x48] sm:$0xff] }
 0x1f3   :  { %v2220_v60 = vadd.f32 %v1267_v16, %v2859_v18  ;;  %v1759_v49 = vmul.f32 %v1664_v45, %v1358_v47  ;;  %v1269_v50 = vpop.f32.mrb[53].mxu0  ;;  %v1360_v51 = vpop.f32.mrb[45].mxu1 }
 0x1f4   :  { %v2221_v52 = vadd.f32 %v1269_v50, %v2864_v20  ;;  %v1760_v53 = vmul.f32 %v1665_v46, %v1360_v51  ;;  %v1271_v54 = vpop.f32.mrb[54].mxu0  ;;  %v1362_v57 = vpop.f32.mrb[46].mxu1  ;;  %v1694_v51 = vld [vmem:[#allocation2 + $0x240] sm:$0xff] }
 0x1f5   :  { %v1797_v62 = vmul.f32 %v2220_v60, %v1702_v6  ;;  %1855 = vst [vmem:[#allocation5 + $0x150] sm:$0xff] %v1759_v49  ;;  %v2222_v4 = vadd.f32 %v1271_v54, %v2866_v21  ;;  %v1764_v61 = vmul.f32 %v1669_v48, %v1362_v57  ;;  %v1273_v9 = vpop.f32.mrb[55].mxu0  ;;  %v1364_v19 = vpop.f32.mrb[47].mxu1  ;;  %v1699_v57 = vld [vmem:[#allocation2 + $0x268] sm:$0xff] }
 0x1f6   :  { %v1798_v18 = vmul.f32 %v2221_v52, %v1703_v17  ;;  %1856 = vst [vmem:[#allocation5 + $0x158] sm:$0xff] %v1760_v53  ;;  %v2223_v63 = vadd.f32 %v1273_v9, %v2868_v22  ;;  %v1765_v25 = vmul.f32 %v1670_v7, %v1364_v19  ;;  %v1713_v22 = vld [vmem:[#allocation2 + $0x2d8] sm:$0xff]  ;;  %v1656_v7 = vld [vmem:[#allocation2 + $0x110] sm:$0xff]  ;;  %v1695_v52 = vld [vmem:[#allocation2 + $0x248] sm:$0xff] }
 0x1f7   :  { %1893 = vst [vmem:[#allocation5 + $0x280] sm:$0xff] %v1797_v62  ;;  %v1802_v8 = vmul.f32 %v2222_v4, %v1707_v55  ;;  %1860 = vst [vmem:[#allocation5 + $0x178] sm:$0xff] %v1764_v61  ;;  %v1646_v53 = vld [vmem:[#allocation2 + $0xc0] sm:$0xff]  ;;  %v1661_v62 = vld [vmem:[#allocation2 + $0x138] sm:$0xff] }
 0x1f8   :  { %1894 = vst [vmem:[#allocation5 + $0x288] sm:$0xff] %v1798_v18  ;;  %v1803_v20 = vmul.f32 %v2223_v63, %v1708_v14  ;;  %1861 = vst [vmem:[#allocation5 + $0x180] sm:$0xff] %v1765_v25  ;;  %v1700_v19 = vld [vmem:[#allocation2 + $0x270] sm:$0xff]  ;;  %v1651_v18 = vld [vmem:[#allocation2 + $0xe8] sm:$0xff] }
 0x1f9   :  { %1898 = vst [vmem:[#allocation5 + $0x2a8] sm:$0xff] %v1802_v8 }
 0x1fa   :  { %1899 = vst [vmem:[#allocation5 + $0x2b0] sm:$0xff] %v1803_v20  ;;  %v1277_v21 = vpop.f32.mrb[56].mxu0  ;;  %v1368_v10 = vpop.f32.mrb[48].mxu1 }
 0x1fb   :  { %v2224_v29 = vadd.f32 %v1277_v21, %v2875_v23  ;;  %v1769_v11 = vmul.f32 %v1674_v26, %v1368_v10  ;;  %v1279_v30 = vpop.f32.mrb[57].mxu0  ;;  %v1370_v31 = vpop.f32.mrb[49].mxu1  ;;  %v1684_v23 = vld [vmem:[#allocation2 + $0x1f0] sm:$0xff] }
 0x1fc   :  { %v2225_v2 = vadd.f32 %v1279_v30, %v2877_v24  ;;  %v1770_v33 = vmul.f32 %v1675_v0, %v1370_v31  ;;  %v1281_v34 = vpop.f32.mrb[58].mxu0  ;;  %v1372_v12 = vpop.f32.mrb[50].mxu1  ;;  %v1705_v30 = vld [vmem:[#allocation2 + $0x298] sm:$0xff] }
 0x1fd   :  { %v1807_v35 = vmul.f32 %v2224_v29, %v1712_v27  ;;  %1865 = vst [vmem:[#allocation5 + $0x1a0] sm:$0xff] %v1769_v11  ;;  %v1774_v1 = vmul.f32 %v1679_v28, %v1372_v12  ;;  %v1282_v36 = vpop.f32.mrb[59].mxu0  ;;  %v1374_v37 = vpop.f32.mrb[51].mxu1  ;;  %v1704_v29 = vld [vmem:[#allocation2 + $0x290] sm:$0xff] }
 0x1fe   :  { %v1808_v38 = vmul.f32 %v2225_v2, %v1713_v22  ;;  %1866 = vst [vmem:[#allocation5 + $0x1a8] sm:$0xff] %v1770_v33  ;;  %v1775_v39 = vmul.f32 %v1680_v32, %v1374_v37  ;;  %v1676_v11 = vld [vmem:[#allocation2 + $0x1b0] sm:$0xff]  ;;  %v1666_v22 = vld [vmem:[#allocation2 + $0x160] sm:$0xff]  ;;  %v1709_v2 = vld [vmem:[#allocation2 + $0x2b8] sm:$0xff] }
 0x1ff   :  { %1903 = vst [vmem:[#allocation5 + $0x2d0] sm:$0xff] %v1807_v35  ;;  %1870 = vst [vmem:[#allocation5 + $0x1c8] sm:$0xff] %v1774_v1  ;;  %v1681_v33 = vld [vmem:[#allocation2 + $0x1d8] sm:$0xff]  ;;  %v1710_v36 = vld [vmem:[#allocation2 + $0x2c0] sm:$0xff] }
 0x200   :  { %1904 = vst [vmem:[#allocation5 + $0x2d8] sm:$0xff] %v1808_v38  ;;  %1871 = vst [vmem:[#allocation5 + $0x1d0] sm:$0xff] %v1775_v39  ;;  %v1671_v37 = vld [vmem:[#allocation2 + $0x188] sm:$0xff] }
 0x202   :  { %v1378_v24 = vpop.f32.mrb[52].mxu1  ;;  %v2180_v58 = vpop.f32.mrb[12].mxu0 }
 0x203   :  { %v1779_v43 = vmul.f32 %v1684_v23, %v1378_v24  ;;  %v1731_v13 = vmul.f32 %v2180_v58, %v1636_v40  ;;  %v1380_v44 = vpop.f32.mrb[53].mxu1  ;;  %v1449_v59 = vpop.f32.mrb[13].mxu0 }
 0x204   :  { %v1780_v45 = vmul.f32 %v1685_v56, %v1380_v44  ;;  %v1721_v46 = vmul.f32 %v1626_v41, %v1449_v59  ;;  %v1382_v16 = vpop.f32.mrb[54].mxu1  ;;  %v2181_v6 = vpop.f32.mrb[14].mxu0  ;;  %v1715_v44 = vld [vmem:[#allocation2 + $0x2e8] sm:$0xff]  ;;  %v1686_v59 = vld [vmem:[#allocation2 + $0x200] sm:$0xff] }
 0x205   :  { %1875 = vst [vmem:[#allocation5 + $0x1f0] sm:$0xff] %v1779_v43  ;;  %1827 = vst.msk [vmem:[#allocation5 + $0x70] sm:$0xff] %vm1816_vm15, %v1731_v13  ;;  %v1784_v47 = vmul.f32 %v1689_v42, %v1382_v16  ;;  %v1736_v48 = vmul.f32 %v2181_v6, %v1641_v3  ;;  %v1384_v60 = vpop.f32.mrb[55].mxu1  ;;  %v1452_v49 = vpop.f32.mrb[15].mxu0  ;;  %v1714_v43 = vld [vmem:[#allocation2 + $0x2e0] sm:$0xff]  ;;  %v1696_v13 = vld [vmem:[#allocation2 + $0x250] sm:$0xff] }
 0x206   :  { %1876 = vst [vmem:[#allocation5 + $0x1f8] sm:$0xff] %v1780_v45  ;;  %1817 = vst.msk [vmem:[#allocation5 + $0x20] sm:$0xff] %vm1816_vm15, %v1721_v46  ;;  %v1785_v50 = vmul.f32 %v1690_v5, %v1384_v60  ;;  %v1726_v17 = vmul.f32 %v1631_v15, %v1452_v49  ;;  %v1701_v45 = vld [vmem:[#allocation2 + $0x278] sm:$0xff] }
 0x207   :  { %1880 = vst [vmem:[#allocation5 + $0x218] sm:$0xff] %v1784_v47  ;;  %1832 = vst.msk [vmem:[#allocation5 + $0x98] sm:$0xff] %vm1816_vm15, %v1736_v48  ;;  %v1691_v48 = vld [vmem:[#allocation2 + $0x228] sm:$0xff] }
 0x208   :  { %1881 = vst [vmem:[#allocation5 + $0x220] sm:$0xff] %v1785_v50  ;;  %1822 = vst.msk [vmem:[#allocation5 + $0x48] sm:$0xff] %vm1816_vm15, %v1726_v17 }
 0x20a   :  { %v1388_v54 = vpop.f32.mrb[56].mxu1  ;;  %v2184_v55 = vpop.f32.mrb[16].mxu0 }
 0x20b   :  { %v1789_v4 = vmul.f32 %v1694_v51, %v1388_v54  ;;  %v1751_v61 = vmul.f32 %v2184_v55, %v1656_v7  ;;  %v1390_v9 = vpop.f32.mrb[57].mxu1  ;;  %v1465_v14 = vpop.f32.mrb[17].mxu0  ;;  %v1716_v54 = vld [vmem:[#allocation2 + $0x2f0] sm:$0xff]  ;;  %v1706_v55 = vld [vmem:[#allocation2 + $0x2a0] sm:$0xff] }
 0x20c   :  { %v1790_v63 = vmul.f32 %v1695_v52, %v1390_v9  ;;  %v1741_v25 = vmul.f32 %v1646_v53, %v1465_v14  ;;  %v1392_v8 = vpop.f32.mrb[58].mxu1  ;;  %v2185_v20 = vpop.f32.mrb[18].mxu0 }
 0x20d   :  { %1885 = vst [vmem:[#allocation5 + $0x240] sm:$0xff] %v1789_v4  ;;  %1847 = vst.msk [vmem:[#allocation5 + $0x110] sm:$0xff] %vm1816_vm15, %v1751_v61  ;;  %v1794_v26 = vmul.f32 %v1699_v57, %v1392_v8  ;;  %v1756_v0 = vmul.f32 %v2185_v20, %v1661_v62  ;;  %v1394_v21 = vpop.f32.mrb[59].mxu1  ;;  %v1468_v27 = vpop.f32.mrb[19].mxu0  ;;  %v1711_v61 = vld [vmem:[#allocation2 + $0x2c8] sm:$0xff] }
 0x20e   :  { %1886 = vst [vmem:[#allocation5 + $0x248] sm:$0xff] %v1790_v63  ;;  %1837 = vst.msk [vmem:[#allocation5 + $0xc0] sm:$0xff] %vm1816_vm15, %v1741_v25  ;;  %v1795_v10 = vmul.f32 %v1700_v19, %v1394_v21  ;;  %v1746_v28 = vmul.f32 %v1651_v18, %v1468_v27 }
 0x20f   :  { %1890 = vst [vmem:[#allocation5 + $0x268] sm:$0xff] %v1794_v26  ;;  %1852 = vst.msk [vmem:[#allocation5 + $0x138] sm:$0xff] %vm1816_vm15, %v1756_v0 }
 0x210   :  { %1891 = vst [vmem:[#allocation5 + $0x270] sm:$0xff] %v1795_v10  ;;  %1842 = vst.msk [vmem:[#allocation5 + $0xe8] sm:$0xff] %vm1816_vm15, %v1746_v28 }
 0x212   :  { %v1398_v31 = vpop.f32.mrb[60].mxu1  ;;  %v2188_v32 = vpop.f32.mrb[20].mxu0 }
 0x213   :  { %v1799_v34 = vmul.f32 %v1704_v29, %v1398_v31  ;;  %v1771_v12 = vmul.f32 %v2188_v32, %v1676_v11  ;;  %v1400_v35 = vpop.f32.mrb[61].mxu1  ;;  %v1481_v1 = vpop.f32.mrb[21].mxu0 }
 0x214   :  { %v1800_v38 = vmul.f32 %v1705_v30, %v1400_v35  ;;  %v1761_v39 = vmul.f32 %v1666_v22, %v1481_v1  ;;  %v1402_v23 = vpop.f32.mrb[62].mxu1  ;;  %v2189_v40 = vpop.f32.mrb[22].mxu0 }
 0x215   :  { %1895 = vst [vmem:[#allocation5 + $0x290] sm:$0xff] %v1799_v34  ;;  %1867 = vst.msk [vmem:[#allocation5 + $0x1b0] sm:$0xff] %vm1816_vm15, %v1771_v12  ;;  %v1804_v56 = vmul.f32 %v1709_v2, %v1402_v23  ;;  %v1776_v41 = vmul.f32 %v2189_v40, %v1681_v33  ;;  %v1404_v24 = vpop.f32.mrb[63].mxu1  ;;  %v1484_v58 = vpop.f32.mrb[23].mxu0 }
 0x216   :  { %1896 = vst [vmem:[#allocation5 + $0x298] sm:$0xff] %v1800_v38  ;;  %1857 = vst.msk [vmem:[#allocation5 + $0x160] sm:$0xff] %vm1816_vm15, %v1761_v39  ;;  %v1805_v42 = vmul.f32 %v1710_v36, %v1404_v24  ;;  %v1766_v3 = vmul.f32 %v1671_v37, %v1484_v58 }
 0x217   :  { %1900 = vst [vmem:[#allocation5 + $0x2b8] sm:$0xff] %v1804_v56  ;;  %1872 = vst.msk [vmem:[#allocation5 + $0x1d8] sm:$0xff] %vm1816_vm15, %v1776_v41 }
 0x218   :  { %1901 = vst [vmem:[#allocation5 + $0x2c0] sm:$0xff] %v1805_v42  ;;  %1862 = vst.msk [vmem:[#allocation5 + $0x188] sm:$0xff] %vm1816_vm15, %v1766_v3 }
 0x21a   :  { %v1408_v5 = vpop.f32.mrb[64].mxu1  ;;  %v2192_v15 = vpop.f32.mrb[24].mxu0 }
 0x21b   :  { %v1809_v46 = vmul.f32 %v1714_v43, %v1408_v5  ;;  %v1791_v16 = vmul.f32 %v2192_v15, %v1696_v13  ;;  %v1410_v6 = vpop.f32.mrb[65].mxu1  ;;  %v1497_v47 = vpop.f32.mrb[25].mxu0 }
 0x21c   :  { %v1810_v60 = vmul.f32 %v1715_v44, %v1410_v6  ;;  %v1781_v49 = vmul.f32 %v1686_v59, %v1497_v47  ;;  %v1412_v50 = vpop.f32.mrb[66].mxu1  ;;  %v2193_v17 = vpop.f32.mrb[26].mxu0 }
 0x21d   :  { %1905 = vst [vmem:[#allocation5 + $0x2e0] sm:$0xff] %v1809_v46  ;;  %1887 = vst.msk [vmem:[#allocation5 + $0x250] sm:$0xff] %vm1816_vm15, %v1791_v16  ;;  %v1796_v51 = vmul.f32 %v2193_v17, %v1701_v45  ;;  %v1413_v7 = vpop.f32.mrb[67].mxu1  ;;  %v1500_v52 = vpop.f32.mrb[27].mxu0 }
 0x21e   :  { %1906 = vst [vmem:[#allocation5 + $0x2e8] sm:$0xff] %v1810_v60  ;;  %1877 = vst.msk [vmem:[#allocation5 + $0x200] sm:$0xff] %vm1816_vm15, %v1781_v49  ;;  %v1786_v53 = vmul.f32 %v1691_v48, %v1500_v52 }
 0x21f   :  { %1892 = vst.msk [vmem:[#allocation5 + $0x278] sm:$0xff] %vm1816_vm15, %v1796_v51 }
 0x220   :  { %1882 = vst.msk [vmem:[#allocation5 + $0x228] sm:$0xff] %vm1816_vm15, %v1786_v53 }
 0x222   :  { %v2196_v57 = vpop.f32.mrb[28].mxu0 }
 0x223   :  { %v1811_v62 = vmul.f32 %v2196_v57, %v1716_v54  ;;  %v1513_v4 = vpop.f32.mrb[29].mxu0 }
 0x224   :  { %v1801_v9 = vmul.f32 %v1706_v55, %v1513_v4  ;;  %v2197_v14 = vpop.f32.mrb[30].mxu0 }
 0x225   :  { %1907 = vst.msk [vmem:[#allocation5 + $0x2f0] sm:$0xff] %vm1816_vm15, %v1811_v62  ;;  %v1516_v19 = vpop.f32.mrb[31].mxu0 }
 0x226   :  { %1897 = vst.msk [vmem:[#allocation5 + $0x2a0] sm:$0xff] %vm1816_vm15, %v1801_v9  ;;  %v1806_v18 = vmul.f32 %v1711_v61, %v1516_v19 }
 0x228   :  { %1902 = vst.msk [vmem:[#allocation5 + $0x2c8] sm:$0xff] %vm1816_vm15, %v1806_v18 }
 0x229   :  { %2470 = shalt.err (!%p2467_p12)
}
 0x22a   :  { %s2471_s4 = scalar_lea.hbm %s2961_s2, 12160 }
 0x22b   :  { %p2472_p13 = scmp.ne.s32.totalorder %s2961_s2, %s2471_s4  ;;  %p2475_p0 = scmp.lt.u32.totalorder %s2471_s4, %s2961_s2 }
 0x22d   :  { %p2477_p1 = pnand %p2475_p0, %p2472_p13 }
 0x22f   :  { %2480 = shalt.err (!%p2477_p1)
}
 0x230   :  { %1919 = dma.vmem_to_hbm [thread:$0]  %s1914_s28, 12160, %s2961_s2, [#allocation4], %s2486_s19, %s2486_s19, %s2487_s20  }
 0x231   :  { %2483 = dma.done.wait [#allocation4], 12160  }
 0x232   :  { %2484 = vsyncadd [#allocation4], 4294955136 }
 0x233   :  { %1923 = vsyncpa [#allocation3], 1 }
 0x234   :  { %1924 = vsyncpa [#allocation4], 1 }

</bundles_post_ra>
